<compile_context>
chip_gen: v7x
topology: tpu7x:2x2x1
jax: 0.10.0
libtpu: 0.0.40
codegen_flags: <defaults>
</compile_context>

<pallas_src>
import jax
import jax.numpy as jnp
from jax.experimental import pallas as pl
from jax.experimental.pallas import tpu as pltpu


def regressor_head_kernel(x_ref, w0_ref, b0_ref, w1_ref, b1_ref, o_ref):
    """Fused fc0 -> ReLU -> fc1 on one (TB, H) batch tile.

    x_ref : (TB, H)   bf16/f32  CLS embeddings for one batch tile
    w0_ref: (H, 128)  bf16      fc0 weight, (in, out) layout, VMEM-resident
    b0_ref: (1, 128)  f32       fc0 bias
    w1_ref: (1, 128)  f32       fc1 weight as a row vector
    b1_ref: (1,)      f32       fc1 bias (SMEM scalar)
    o_ref : (TB, 1)   f32
    """
    x = x_ref[...].astype(jnp.bfloat16)                    # no-op if already bf16
    # fc0: bf16 x bf16 on the MXU with f32 accumulation.
    h = jnp.dot(x, w0_ref[...], preferred_element_type=jnp.float32)
    h = jnp.maximum(h + b0_ref[...], 0.0)                  # bias + ReLU in f32 (VPU)
    # fc1 (128 -> 1): VPU multiply + lane reduction instead of an N=1 MXU matmul.
    y = jnp.sum(h * w1_ref[...], axis=-1, keepdims=True) + b1_ref[0]
    o_ref[...] = y.astype(o_ref.dtype)


def regressor_head(x2d, w0, b0, w1_row, b1):
    """Fused regression head.

    x2d: (B, C) with the CLS embedding in columns [0, H) (C == H or C == S*H).
    w0:  (H, 128) bf16, b0: (1, 128) f32, w1_row: (1, 128) f32, b1: (1,) f32.
    Returns (B, 1) f32.
    """
    B = x2d.shape[0]
    H, F0 = w0.shape
    F1 = 1

    # Batch tile: big enough to amortize per-step overhead, small enough that
    # double-buffered (TB, H) bf16 tiles fit easily in v7x's 32 MiB scoped VMEM
    # (H=1024 bf16 -> 2 MiB per buffer).
    TB = B if B <= 1024 else 1024
    grid = (pl.cdiv(B, TB),)

    cost = pl.CostEstimate(
        flops=2 * B * H * F0 + 4 * B * F0,
        transcendentals=0,
        bytes_accessed=int(B * H * x2d.dtype.itemsize
                           + H * F0 * w0.dtype.itemsize
                           + 2 * F0 * 4 + 4
                           + B * F1 * 4),
    )

    out = pl.pallas_call(
        regressor_head_kernel,
        out_shape=jax.ShapeDtypeStruct((B, F1), jnp.float32),
        grid=grid,
        in_specs=[
            # Batch-tiled CLS columns (column-block 0 of the (B, C) view).
            pl.BlockSpec((TB, H), lambda i: (i, 0)),
            # Weights / biases: constant block index -> stay resident in VMEM.
            pl.BlockSpec((H, F0), lambda i: (0, 0)),
            pl.BlockSpec((1, F0), lambda i: (0, 0)),
            pl.BlockSpec((1, F0), lambda i: (0, 0)),
            # fc1 bias: scalar in SMEM (no padded VMEM tile / DMA descriptor).
            pl.BlockSpec(memory_space=pltpu.MemorySpace.SMEM),
        ],
        out_specs=pl.BlockSpec((TB, F1), lambda i: (i, 0)),
        compiler_params=pltpu.CompilerParams(
            dimension_semantics=("parallel",)),
        cost_estimate=cost,
    )(x2d, w0, b0, w1_row, b1)
    return out


def model_regressor_forward(hidden_states, params):
    """Mirror of ModelRegressor.forward given the BERT last hidden state.

    hidden_states: (B, S, H) — stand-in for outputs.hidden_states[-1].
    Returns: (B,) float32 — matches x.squeeze(-1).
    """
    B, S, H = hidden_states.shape
    if H % 128 == 0 or S == 1:
        # CLS extraction fused into the kernel: (B, S, H) viewed as (B, S*H)
        # (free, contiguous reshape); the (TB, H) block at column-block 0 is
        # exactly hidden_states[:, 0, :], DMA'd straight from HBM.
        x2d = hidden_states.reshape(B, S * H)
    else:
        # Lane-misaligned hidden size: fall back to materializing the slice.
        x2d = hidden_states[:, 0, :]
    y = regressor_head(x2d, params["w0"], params["b0"],
                       params["w1_row"], params["b1"])       # (B, 1)
    return jnp.squeeze(y, axis=-1)                           # (B,)


def init_params(key, hidden_size, f0=128):
    """Deterministic PyTorch-style Linear init (uniform ±1/sqrt(fan_in))."""
    k0w, k0b, k1w, k1b = jax.random.split(key, 4)
    lim0 = 1.0 / jnp.sqrt(hidden_size)
    lim1 = 1.0 / jnp.sqrt(f0)
    return {
        # fc0 weight stored (in, out), bf16 (halves resident VMEM + HBM bytes);
        # accumulation stays f32 inside the kernel.
        "w0": jax.random.uniform(k0w, (hidden_size, f0), jnp.float32,
                                 -lim0, lim0).astype(jnp.bfloat16),
        "b0": jax.random.uniform(k0b, (1, f0), jnp.float32, -lim0, lim0),
        # fc1 weight kept f32 as a (1, 128) row (applied on the VPU),
        # fc1 bias as an SMEM scalar.
        "w1_row": jax.random.uniform(k1w, (1, f0), jnp.float32, -lim1, lim1),
        "b1": jax.random.uniform(k1b, (1,), jnp.float32, -lim1, lim1),
    }


if __name__ == "__main__":
    # Small shapes: batch=4, seq=8, hidden=128 (lane-aligned stand-in for BERT's 768).
    B, S, H = 4, 8, 128

    key = jax.random.PRNGKey(0)
    k_hidden, k_params = jax.random.split(key)

    # Synthetic "BERT last hidden state" (the pretrained backbone is external),
    # kept in bf16 — the head is HBM-bandwidth bound.
    hidden_states = jax.random.normal(
        k_hidden, (B, S, H), jnp.float32).astype(jnp.bfloat16)
    params = init_params(k_params, H)

    out = jax.block_until_ready(model_regressor_forward(hidden_states, params))

    # Pure-JAX reference of the head (same bf16 operands, f32 math).
    pooled = hidden_states[:, 0, :].astype(jnp.float32)
    ref = jnp.maximum(pooled @ params["w0"].astype(jnp.float32) + params["b0"], 0.0)
    ref = jnp.sum(ref * params["w1_row"], axis=-1) + params["b1"][0]

    assert out.shape == (B,)
    assert jnp.allclose(out, ref, atol=1e-3, rtol=1e-3), (out, ref)

    print("KERNEL_OK")
</pallas_src>

<mosaic_0001>
module attributes {stable_mosaic.version = 11 : i64} {
  func.func @regressor_head_kernel(%arg0: i32, %arg1: memref<4x128xbf16, #tpu.memory_space<vmem>>, %arg2: memref<128x128xbf16, #tpu.memory_space<vmem>>, %arg3: memref<1x128xf32, #tpu.memory_space<vmem>>, %arg4: memref<1x128xf32, #tpu.memory_space<vmem>>, %arg5: memref<1xf32, #tpu.memory_space<smem>>, %arg6: memref<4x1xf32, #tpu.memory_space<vmem>>) attributes {dimension_semantics = [#tpu.dimension_semantics<parallel>], iteration_bounds = array<i64: 1>, scalar_prefetch = 0 : i64, scratch_operands = 0 : i64, tpu.core_type = #tpu.core_type<tc>, window_params = [{transform_indices = @transform_0, window_bounds = array<i64: 4, 128>}, {pipeline_mode = #tpu.pipeline_mode<synchronous>, transform_indices = @transform_1, window_bounds = array<i64: 128, 128>}, {pipeline_mode = #tpu.pipeline_mode<synchronous>, transform_indices = @transform_2, window_bounds = array<i64: 1, 128>}, {pipeline_mode = #tpu.pipeline_mode<synchronous>, transform_indices = @transform_3, window_bounds = array<i64: 1, 128>}, {transform_indices = @transform_4, window_bounds = array<i64: 1>}, {transform_indices = @transform_5, window_bounds = array<i64: 4, 1>}]} {
    %c0 = arith.constant 0 : index
    %c0_0 = arith.constant 0 : index
    %0 = vector.load %arg1[%c0, %c0_0] : memref<4x128xbf16, #tpu.memory_space<vmem>>, vector<4x128xbf16>
    %c0_1 = arith.constant 0 : index
    %c0_2 = arith.constant 0 : index
    %1 = vector.load %arg2[%c0_1, %c0_2] : memref<128x128xbf16, #tpu.memory_space<vmem>>, vector<128x128xbf16>
    %cst = arith.constant dense<0.000000e+00> : vector<4x128xf32>
    %2 = tpu.matmul %0, %1, %cst {dimension_numbers = #tpu.dot_dimension_numbers<[1], [0], [0], [1], [0, 0, 1, 1], [], []>} : vector<4x128xbf16>, vector<128x128xbf16>, vector<4x128xf32> -> vector<4x128xf32>
    %c0_3 = arith.constant 0 : index
    %c0_4 = arith.constant 0 : index
    %3 = vector.load %arg3[%c0_3, %c0_4] : memref<1x128xf32, #tpu.memory_space<vmem>>, vector<1x128xf32>
    %4 = vector.broadcast %3 : vector<1x128xf32> to vector<4x128xf32>
    %5 = arith.addf %2, %4 : vector<4x128xf32>
    %cst_5 = arith.constant 0.000000e+00 : f32
    %6 = vector.broadcast %cst_5 : f32 to vector<4x128xf32>
    %7 = arith.maximumf %5, %6 : vector<4x128xf32>
    %c0_6 = arith.constant 0 : index
    %c0_7 = arith.constant 0 : index
    %8 = vector.load %arg4[%c0_6, %c0_7] : memref<1x128xf32, #tpu.memory_space<vmem>>, vector<1x128xf32>
    %9 = vector.broadcast %8 : vector<1x128xf32> to vector<4x128xf32>
    %10 = arith.mulf %7, %9 : vector<4x128xf32>
    %cst_8 = arith.constant dense<0.000000e+00> : vector<4xf32>
    %11 = vector.multi_reduction <add>, %10, %cst_8 [1] : vector<4x128xf32> to vector<4xf32>
    %12 = vector.shape_cast %11 : vector<4xf32> to vector<4x1xf32>
    %c0_9 = arith.constant 0 : index
    %13 = memref.load %arg5[%c0_9] : memref<1xf32, #tpu.memory_space<smem>>
    %14 = vector.broadcast %13 : f32 to vector<4x1xf32>
    %15 = arith.addf %12, %14 : vector<4x1xf32>
    %c0_10 = arith.constant 0 : index
    %c0_11 = arith.constant 0 : index
    %16 = vector.load %arg6[%c0_10, %c0_11] : memref<4x1xf32, #tpu.memory_space<vmem>>, vector<4x1xf32>
    tpu.vector_store %arg6[%c0_10, %c0_11], %15 {strides = array<i32>} : memref<4x1xf32, #tpu.memory_space<vmem>>, vector<4x1xf32>,
    return
  }
  func.func @transform_0(%arg0: i32) -> (i32, i32) {
    %c0_i32 = arith.constant 0 : i32
    %c0_i32_0 = arith.constant 0 : i32
    return %arg0, %c0_i32 : i32, i32
  }
  func.func @transform_1(%arg0: i32) -> (i32, i32) {
    %c0_i32 = arith.constant 0 : i32
    %c0_i32_0 = arith.constant 0 : i32
    %c0_i32_1 = arith.constant 0 : i32
    return %c0_i32, %c0_i32_0 : i32, i32
  }
  func.func @transform_2(%arg0: i32) -> (i32, i32) {
    %c0_i32 = arith.constant 0 : i32
    %c0_i32_0 = arith.constant 0 : i32
    %c0_i32_1 = arith.constant 0 : i32
    return %c0_i32, %c0_i32_0 : i32, i32
  }
  func.func @transform_3(%arg0: i32) -> (i32, i32) {
    %c0_i32 = arith.constant 0 : i32
    %c0_i32_0 = arith.constant 0 : i32
    %c0_i32_1 = arith.constant 0 : i32
    return %c0_i32, %c0_i32_0 : i32, i32
  }
  func.func @transform_4(%arg0: i32) -> i32 {
    %c0_i32 = arith.constant 0 : i32
    %c0_i32_0 = arith.constant 0 : i32
    return %c0_i32 : i32
  }
  func.func @transform_5(%arg0: i32) -> (i32, i32) {
    %c0_i32 = arith.constant 0 : i32
    %c0_i32_0 = arith.constant 0 : i32
    return %arg0, %c0_i32 : i32, i32
  }
}

</mosaic_0001>

<bundles_post_ra>
// kernel: tpu_custom_call.1
= control target key start
LH: loop header
LB: loop body
LE: loop exit
PB: predicated region body
PF: predicated region fallthrough
CT: control target
= control target key end

     0   :  { %11 = vsyncpa [#allocation4], 0  ;;  %s367_s0 = inlined_call_operand.hbm [shape: bf16[4,1024], index: 0, kind: input, shape index: {}]   ;;  %s368_s1 = inlined_call_operand.hbm [shape: bf16[128,128], index: 1, kind: input, shape index: {}]   ;;  %s369_s2 = inlined_call_operand.vmem [shape: f32[1,128], index: 2, kind: input, shape index: {}]   ;;  %s370_s3 = inlined_call_operand.vmem [shape: f32[1,128], index: 3, kind: input, shape index: {}]   ;;  %s371_s4 = inlined_call_operand.<no memory space> [shape: f32[1], index: 4, kind: input, shape index: {}]   ;;  %s372_s5 = inlined_call_operand.vmem [shape: f32[4,1], index: 5, kind: output, shape index: {}]  }
   0x1   :  { %12 = vsyncpa [#allocation6], 0  ;;  %s285_s18 = smov [#allocation3]   ;;  %s286_s20 = smov [#allocation5]  }
   0x2   :  { %s19_s19 = sshll.u32 %s285_s18, 4  ;;  %s28_s21 = sshll.u32 %s286_s20, 4  ;;  %s20_s19 = int_to_ptr.vmem [resolvable:$true] %s19_s19  ;;  %s321_s21 = int_to_ptr.vmem [resolvable:$true] %s28_s21 }
   0x3   :  { %s237_s24 = scalar_lea.hbm %s367_s0, 32  ;;  %s239_s29 = scalar_lea.hbm %s367_s0, 256 }
   0x4   :  { %p238_p0 = scmp.ne.s32.totalorder %s367_s0, %s237_s24  ;;  %p240_p1 = scmp.lt.u32.totalorder %s239_s29, %s237_s24 }
   0x5   :  { %p241_p2 = scmp.lt.u32.totalorder %s237_s24, %s367_s0 }
   0x7   :  { %p242_p3 = por %p241_p2, %p240_p1 }
   0x9   :  { %p243_p4 = pnand %p242_p3, %p238_p0 }
   0xb   :  { %246 = shalt.err (!%p243_p4)
}
   0xc   :  { %s247_s7 = scalar_lea.vmem %s20_s19, 32  ;;  %p252_p6 = scmp.lt.s32.totalorder %s20_s19, %s20_s19 }
   0xd   :  { %p248_p5 = scmp.ne.s32.totalorder %s20_s19, %s247_s7  ;;  %p253_p7 = scmp.lt.s32.totalorder %s247_s7, %s247_s7 }
   0xf   :  { %p254_p8 = por %p253_p7, %p252_p6 }
  0x11   :  { %p255_p9 = pnand %p254_p8, %p248_p5 }
  0x13   :  { %258 = shalt.err (!%p255_p9)
}
  0x14   :  { %22 = dma.hbm_to_vmem [thread:$0]  %s367_s0, 32, %s20_s19, [#allocation4]  }
  0x15   :  { %s259_s12 = scalar_lea.hbm %s368_s1, 1024 }
  0x16   :  { %p260_p10 = scmp.ne.s32.totalorder %s368_s1, %s259_s12  ;;  %p263_p11 = scmp.lt.u32.totalorder %s259_s12, %s368_s1 }
  0x18   :  { %p265_p12 = pnand %p263_p11, %p260_p10 }
  0x1a   :  { %268 = shalt.err (!%p265_p12)
}
  0x1b   :  { %s269_s17 = scalar_lea.vmem %s321_s21, 1024  ;;  %p274_p0 = scmp.lt.s32.totalorder %s321_s21, %s321_s21 }
  0x1c   :  { %p270_p13 = scmp.ne.s32.totalorder %s321_s21, %s269_s17  ;;  %p275_p1 = scmp.lt.s32.totalorder %s269_s17, %s269_s17 }
  0x1e   :  { %p276_p2 = por %p275_p1, %p274_p0 }
  0x20   :  { %p277_p3 = pnand %p276_p2, %p270_p13 }
  0x22   :  { %280 = shalt.err (!%p277_p3)
}
  0x23   :  { %s287_s0 = smov 64   ;;  %s288_s18 = smov 4  }
  0x24   :  { %34 = dma.hbm_to_vmem [thread:$0]  %s368_s1, 1024, %s321_s21, [#allocation6], %s287_s0, %s287_s0, %s288_s18  }
  0x25   :  { %281 = dma.done.wait [#allocation4], 32  }
  0x26   :  { %282 = vsyncadd [#allocation4], 4294967264 }
  0x27   :  { %283 = dma.done.wait [#allocation6], 1024  }
  0x28   :  { %284 = vsyncadd [#allocation6], 4294966272  ;;  %v289_v0 = vmov 0.0   ;;  %vm290_vm0 = vmmov 0   ;;  %v229_v1 = vld [vmem:[#allocation5] sm:$0xff]   ;;  %v230_v2 = vld [vmem:[#allocation5 + $0x8] sm:$0xff]   ;;  %v174_v20 = vstv %s371_s4 }
  0x29   :  { %203 = vmatprep.subr.bf16.mxu0 %v289_v0  ;;  %219 = vmatprep.mubr.msk.bf16.mxu0 %vm290_vm0, %v289_v0  ;;  %v231_v3 = vld [vmem:[#allocation5 + $0x10] sm:$0xff]   ;;  %v232_v4 = vld [vmem:[#allocation5 + $0x18] sm:$0xff]   ;;  %v233_v5 = vld [vmem:[#allocation5 + $0x20] sm:$0xff]   ;;  %vm169_vm1 = vcmask 1043456   ;;  %vm176_vm2 = vcmask 3072  }
  0x2a   :  { %204 = vmatpush3.bf16.msra.mxu0 %v229_v1  ;;  %v234_v6 = vld [vmem:[#allocation5 + $0x28] sm:$0xff]   ;;  %v235_v7 = vld [vmem:[#allocation5 + $0x30] sm:$0xff]   ;;  %v236_v8 = vld [vmem:[#allocation5 + $0x38] sm:$0xff]  }
  0x2b   :  { %205 = vmatprep.subr.bf16.mxu0 %v289_v0  ;;  %v48_v9 = vld [vmem:[#allocation3] sm:$0x3] }
  0x2c   :  { %v184_v10 = vld [vmem:[%s369_s2] ss:$0 sm:$0xff] }
  0x2d   :  { %v193_v15 = vld [vmem:[%s370_s3] ss:$0 sm:$0xff] }
  0x2e   :  { %206 = vmatpush3.bf16.msra.mxu0 %v230_v2 }
  0x2f   :  { %207 = vmatprep.subr.bf16.mxu0 %v289_v0 }
  0x32   :  { %208 = vmatpush3.bf16.msra.mxu0 %v231_v3 }
  0x33   :  { %209 = vmatprep.subr.bf16.mxu0 %v289_v0 }
  0x36   :  { %210 = vmatpush3.bf16.msra.mxu0 %v232_v4 }
  0x37   :  { %211 = vmatprep.subr.bf16.mxu0 %v289_v0 }
  0x3a   :  { %212 = vmatpush3.bf16.msra.mxu0 %v233_v5 }
  0x3b   :  { %213 = vmatprep.subr.bf16.mxu0 %v289_v0 }
  0x3e   :  { %214 = vmatpush3.bf16.msra.mxu0 %v234_v6 }
  0x3f   :  { %215 = vmatprep.subr.bf16.mxu0 %v289_v0 }
  0x42   :  { %216 = vmatpush3.bf16.msra.mxu0 %v235_v7 }
  0x43   :  { %217 = vmatprep.subr.bf16.mxu0 %v289_v0 }
  0x46   :  { %218 = vmatpush3.bf16.msra.mxu0 %v236_v8 }
  0x49   :  { %220 = vmatmul.mubr.bf16.vlgmr.msra.gmra.mrb[0].mxu0 %v48_v9 }
 0x11c   :  { %v154_v11 = vpop.f32.mrb[0].mxu0 }
 0x11d   :  { %v155_v12 = vadd.f32 %v184_v10, %v154_v11  ;;  %v221_v13 = vpop.f32.mrb[1].mxu0 }
 0x11e   :  { %v157_v14 = vpop.f32.mrb[2].mxu0 }
 0x11f   :  { %v160_v16 = vmax.f32 %v155_v12, 0.0  ;;  %v222_v17 = vpop.f32.mrb[3].mxu0 }
 0x121   :  { %v168_v18 = vmul.f32 %v193_v15, %v160_v16 }
 0x123   :  { %v170_v19 = vsel %vm169_vm1, %v168_v18, 0.0 }
 0x124   :  { %171 = vadd.xlane.f32.xlu0 %v170_v19 }
 0x1b1   :  { %v172_v21 = vpop.xlane.xlu0 %171 }
 0x1b2   :  { %v175_v22 = vadd.f32 %v174_v20, %v172_v21 }
 0x1b4   :  { %177 = vst.msk [vmem:[%s372_s5] sm:$0xf] %vm176_vm2, %v175_v22 }
 0x1b5   :  { %182 = vsyncpa [#allocation4], 1 }
 0x1b6   :  { %183 = vsyncpa [#allocation6], 1 }

</bundles_post_ra>
